<compile_context>
chip_gen: v5e
topology: v5e:2x2
jax: 0.10.0
libtpu: 0.0.40
codegen_flags: <defaults>
</compile_context>

<pallas_src>
import functools

import jax
import jax.numpy as jnp
from jax import lax
from jax.experimental import pallas as pl
from jax.experimental.pallas import tpu as pltpu


def _dilated_residual_kernel(x_ref, wdf_ref, bd_ref, w1_ref, b1_ref, o_ref, xwin_ref,
                             *, dilation, T, T_TILE, nt):
    # x_ref:    (1, C, T)            one batch element, resident across the t grid axis
    # wdf_ref:  (C, 3*C)             dilated conv taps flattened for one fused matmul
    # bd_ref:   (C, 1)
    # w1_ref:   (C, C)               1x1 conv weight
    # b1_ref:   (C, 1)
    # o_ref:    (1, C, T_TILE)       output tile (time on lanes -> lane-dense stores)
    # xwin_ref: (nt, C, T_TILE+2d)   scratch: per-tile zero-padded input windows
    d = dilation
    t = pl.program_id(1)
    W = T_TILE + 2 * d

    # Once per batch element (t == 0): build zero-padded per-tile windows in VMEM.
    # All slice bounds are Python ints -> static loads/stores; this replaces a
    # wrapper-side jnp.pad (and its extra full HBM read+write pass).
    @pl.when(t == 0)
    def _build_windows():
        xwin_ref[...] = jnp.zeros_like(xwin_ref)
        x = x_ref[0]                                    # (C, T)
        for j in range(nt):                             # nt is a trace-time constant
            src0 = j * T_TILE - d                       # window start in input coords
            lo = max(0, -src0)
            hi = min(W, T - src0)
            if hi > lo:
                xwin_ref[j, :, lo:hi] = x[:, src0 + lo:src0 + hi]

    xw = xwin_ref[t]                                    # (C, W), dynamic leading index only

    # Dilated conv: all 3 taps fused into one K=3*C MXU matmul (static lane offsets 0, d, 2d).
    stacked = jnp.concatenate(
        [xw[:, 0:T_TILE], xw[:, d:d + T_TILE], xw[:, 2 * d:2 * d + T_TILE]],
        axis=0)                                         # (3C, T_TILE)
    h = jnp.dot(wdf_ref[...], stacked, preferred_element_type=jnp.float32) + bd_ref[...]
    h = jnp.maximum(h, 0.0)                             # ReLU

    # 1x1 conv (plain channel matmul) + bias.
    y = jnp.dot(w1_ref[...], h, preferred_element_type=jnp.float32) + b1_ref[...]

    # nn.Dropout is identity in eval mode. Residual add reuses the unshifted center of
    # the window (no second HBM stream for x).
    o_ref[0] = (xw[:, d:d + T_TILE].astype(jnp.float32) + y).astype(o_ref.dtype)


def dilated_residual_layer(x_nct, w_dilated, b_dilated, w_1x1, b_1x1, dilation,
                           *, t_tile=512):
    """x_nct: (N, C, T). w_dilated: (Cout, Cin, 3). w_1x1: (Cout, Cout, 1)."""
    N, C, T = x_nct.shape
    Cout, Cin, K = w_dilated.shape
    assert K == 3 and Cin == C and Cout == C
    d = int(dilation)

    # Time tiling: full-T block when short, otherwise 128-multiple tiles (lane-dense stores).
    if T <= t_tile:
        T_TILE = T
        T_round = T
    else:
        assert t_tile % 128 == 0, "t_tile must be a multiple of 128"
        T_TILE = t_tile
        T_round = ((T + T_TILE - 1) // T_TILE) * T_TILE
    nt = T_round // T_TILE

    # Tiny weight reshapes (the only wrapper-side device work).
    wdf = jnp.transpose(w_dilated, (0, 2, 1)).reshape(Cout, 3 * Cin)  # (Cout, 3*Cin), tap-major
    bd = b_dilated.reshape(Cout, 1)
    w1 = w_1x1[:, :, 0]                                               # (Cout, Cin)
    b1 = b_1x1.reshape(Cout, 1)

    kernel = functools.partial(_dilated_residual_kernel, dilation=d, T=T,
                               T_TILE=T_TILE, nt=nt)

    flops = 2 * N * T_round * Cout * (3 * Cin) + 2 * N * T_round * Cout * Cout
    bytes_accessed = (x_nct.size + N * C * T_round + wdf.size + w1.size + 2 * Cout) * 4

    out = pl.pallas_call(
        kernel,
        out_shape=jax.ShapeDtypeStruct((N, C, T_round), x_nct.dtype),
        grid_spec=pltpu.PrefetchScalarGridSpec(
            num_scalar_prefetch=0,
            grid=(N, nt),
            in_specs=[
                pl.BlockSpec((1, C, T), lambda n, t: (n, 0, 0)),      # x: resident across t
                pl.BlockSpec((Cout, 3 * Cin), lambda n, t: (0, 0)),   # fused dilated weights
                pl.BlockSpec((Cout, 1), lambda n, t: (0, 0)),
                pl.BlockSpec((Cout, Cout), lambda n, t: (0, 0)),
                pl.BlockSpec((Cout, 1), lambda n, t: (0, 0)),
            ],
            out_specs=pl.BlockSpec((1, C, T_TILE), lambda n, t: (n, 0, t)),
            scratch_shapes=[pltpu.VMEM((nt, C, T_TILE + 2 * d), x_nct.dtype)],
        ),
        compiler_params=pltpu.CompilerParams(
            # t must stay "arbitrary": the per-batch window build at t==0 requires the
            # time tiles of a batch element to run sequentially on one core.
            dimension_semantics=("parallel", "arbitrary")),
        cost_estimate=pl.CostEstimate(flops=flops, transcendentals=0,
                                      bytes_accessed=bytes_accessed),
    )(x_nct, wdf, bd, w1, b1)

    if T_round != T:
        out = out[:, :, :T]
    return out


def _reference(x_nct, w_dilated, b_dilated, w_1x1, b_1x1, dilation):
    # Pure-JAX reference mimicking the PyTorch forward (dropout = identity in eval).
    dn = ("NCW", "OIW", "NCW")
    out = lax.conv_general_dilated(
        x_nct, w_dilated, window_strides=(1,), padding=[(dilation, dilation)],
        rhs_dilation=(dilation,), dimension_numbers=dn)
    out = out + b_dilated[None, :, None]
    out = jnp.maximum(out, 0.0)
    out = lax.conv_general_dilated(
        out, w_1x1, window_strides=(1,), padding=[(0, 0)], dimension_numbers=dn)
    out = out + b_1x1[None, :, None]
    return x_nct + out


def _make_params(key, C):
    k2, k3, k4, k5 = jax.random.split(key, 4)
    w_d = jax.random.normal(k2, (C, C, 3), dtype=jnp.float32) * 0.1
    b_d = jax.random.normal(k3, (C,), dtype=jnp.float32) * 0.1
    w_1 = jax.random.normal(k4, (C, C, 1), dtype=jnp.float32) * 0.1
    b_1 = jax.random.normal(k5, (C,), dtype=jnp.float32) * 0.1
    return w_d, b_d, w_1, b_1


if __name__ == "__main__":
    key = jax.random.PRNGKey(0)
    kx1, kp1, kx2, kp2 = jax.random.split(key, 4)

    # Case 1: small shape, single time tile (full-T block path).
    N, C, T, dilation = 2, 8, 16, 2
    x = jax.random.normal(kx1, (N, C, T), dtype=jnp.float32)
    w_d, b_d, w_1, b_1 = _make_params(kp1, C)
    out = dilated_residual_layer(x, w_d, b_d, w_1, b_1, dilation)
    out = jax.block_until_ready(out)
    ref = _reference(x, w_d, b_d, w_1, b_1, dilation)
    assert out.shape == (N, C, T)
    assert jnp.allclose(out, ref, atol=1e-4, rtol=1e-4), "mismatch vs reference (case 1)"

    # Case 2: exercises the time-tiled path (nt=2, 128-lane tiles, halo across tile edge).
    N2, C2, T2, dil2 = 2, 8, 256, 4
    x2 = jax.random.normal(kx2, (N2, C2, T2), dtype=jnp.float32)
    w_d2, b_d2, w_12, b_12 = _make_params(kp2, C2)
    out2 = dilated_residual_layer(x2, w_d2, b_d2, w_12, b_12, dil2, t_tile=128)
    out2 = jax.block_until_ready(out2)
    ref2 = _reference(x2, w_d2, b_d2, w_12, b_12, dil2)
    assert out2.shape == (N2, C2, T2)
    assert jnp.allclose(out2, ref2, atol=1e-4, rtol=1e-4), "mismatch vs reference (case 2)"

    print("KERNEL_OK")
</pallas_src>

<mosaic_0001>
module attributes {stable_mosaic.version = 11 : i64} {
  func.func @_dilated_residual_kernel(%arg0: i32, %arg1: i32, %arg2: memref<1x8x16xf32, #tpu.memory_space<vmem>>, %arg3: memref<8x24xf32, #tpu.memory_space<vmem>>, %arg4: memref<8x1xf32, #tpu.memory_space<vmem>>, %arg5: memref<8x8xf32, #tpu.memory_space<vmem>>, %arg6: memref<8x1xf32, #tpu.memory_space<vmem>>, %arg7: memref<1x8x16xf32, #tpu.memory_space<vmem>>, %arg8: memref<1x8x20xf32, #tpu.memory_space<vmem>>) attributes {dimension_semantics = [#tpu.dimension_semantics<parallel>, #tpu.dimension_semantics<arbitrary>], iteration_bounds = array<i64: 2, 1>, scalar_prefetch = 0 : i64, scratch_operands = 1 : i64, tpu.core_type = #tpu.core_type<tc>, window_params = [{transform_indices = @transform_0, window_bounds = array<i64: 1, 8, 16>}, {pipeline_mode = #tpu.pipeline_mode<synchronous>, transform_indices = @transform_1, window_bounds = array<i64: 8, 24>}, {pipeline_mode = #tpu.pipeline_mode<synchronous>, transform_indices = @transform_2, window_bounds = array<i64: 8, 1>}, {pipeline_mode = #tpu.pipeline_mode<synchronous>, transform_indices = @transform_3, window_bounds = array<i64: 8, 8>}, {pipeline_mode = #tpu.pipeline_mode<synchronous>, transform_indices = @transform_4, window_bounds = array<i64: 8, 1>}, {transform_indices = @transform_5, window_bounds = array<i64: 1, 8, 16>}]} {
    %c0_i32 = arith.constant 0 : i32
    %0 = arith.cmpi eq, %arg1, %c0_i32 : i32
    %1 = arith.extui %0 : i1 to i32
    %c0_i32_0 = arith.constant 0 : i32
    %2 = arith.cmpi ne, %1, %c0_i32_0 : i32
    scf.if %2 {
      %cst_15 = arith.constant 0.000000e+00 : f32
      %27 = vector.broadcast %cst_15 : f32 to vector<1x8x20xf32>
      %c0_16 = arith.constant 0 : index
      %c0_17 = arith.constant 0 : index
      %c0_18 = arith.constant 0 : index
      %28 = vector.load %arg8[%c0_16, %c0_17, %c0_18] : memref<1x8x20xf32, #tpu.memory_space<vmem>>, vector<1x8x20xf32>
      tpu.vector_store %arg8[%c0_16, %c0_17, %c0_18], %27 {strides = array<i32>} : memref<1x8x20xf32, #tpu.memory_space<vmem>>, vector<1x8x20xf32>,
      %c0_19 = arith.constant 0 : index
      %c0_20 = arith.constant 0 : index
      %c0_21 = arith.constant 0 : index
      %29 = vector.load %arg2[%c0_19, %c0_20, %c0_21] : memref<1x8x16xf32, #tpu.memory_space<vmem>>, vector<1x8x16xf32>
      %30 = vector.shape_cast %29 : vector<1x8x16xf32> to vector<8x16xf32>
      %c0_22 = arith.constant 0 : index
      %c0_23 = arith.constant 0 : index
      %c2 = arith.constant 2 : index
      %31 = vector.load %arg8[%c0_22, %c0_23, %c2] : memref<1x8x20xf32, #tpu.memory_space<vmem>>, vector<1x8x16xf32>
      %32 = vector.shape_cast %31 : vector<1x8x16xf32> to vector<8x16xf32>
      %33 = vector.shape_cast %30 : vector<8x16xf32> to vector<1x8x16xf32>
      tpu.vector_store %arg8[%c0_22, %c0_23, %c2], %33 {strides = array<i32>} : memref<1x8x20xf32, #tpu.memory_space<vmem>>, vector<1x8x16xf32>,
    } else {
    }
    %3 = arith.index_cast %arg1 : i32 to index
    %c0 = arith.constant 0 : index
    %c0_1 = arith.constant 0 : index
    %4 = vector.load %arg8[%3, %c0, %c0_1] : memref<1x8x20xf32, #tpu.memory_space<vmem>>, vector<1x8x20xf32>
    %5 = vector.shape_cast %4 : vector<1x8x20xf32> to vector<8x20xf32>
    %6 = vector.extract_strided_slice %5 {offsets = [0, 0], sizes = [8, 16], strides = [1, 1]} : vector<8x20xf32> to vector<8x16xf32>
    %7 = vector.extract_strided_slice %5 {offsets = [0, 2], sizes = [8, 16], strides = [1, 1]} : vector<8x20xf32> to vector<8x16xf32>
    %8 = vector.extract_strided_slice %5 {offsets = [0, 4], sizes = [8, 16], strides = [1, 1]} : vector<8x20xf32> to vector<8x16xf32>
    %9 = tpu.concatenate %6, %7, %8 in 0 : vector<8x16xf32>, vector<8x16xf32>, vector<8x16xf32> -> vector<24x16xf32>
    %c0_2 = arith.constant 0 : index
    %c0_3 = arith.constant 0 : index
    %10 = vector.load %arg3[%c0_2, %c0_3] : memref<8x24xf32, #tpu.memory_space<vmem>>, vector<8x24xf32>
    %cst = arith.constant dense<0.000000e+00> : vector<8x16xf32>
    %11 = tpu.matmul %10, %9, %cst {dimension_numbers = #tpu.dot_dimension_numbers<[1], [0], [0], [1], [0, 0, 1, 1], [], []>} : vector<8x24xf32>, vector<24x16xf32>, vector<8x16xf32> -> vector<8x16xf32>
    %c0_4 = arith.constant 0 : index
    %c0_5 = arith.constant 0 : index
    %12 = vector.load %arg4[%c0_4, %c0_5] : memref<8x1xf32, #tpu.memory_space<vmem>>, vector<8x1xf32>
    %13 = vector.broadcast %12 : vector<8x1xf32> to vector<8x16xf32>
    %14 = arith.addf %11, %13 : vector<8x16xf32>
    %cst_6 = arith.constant 0.000000e+00 : f32
    %15 = vector.broadcast %cst_6 : f32 to vector<8x16xf32>
    %16 = arith.maximumf %14, %15 : vector<8x16xf32>
    %c0_7 = arith.constant 0 : index
    %c0_8 = arith.constant 0 : index
    %17 = vector.load %arg5[%c0_7, %c0_8] : memref<8x8xf32, #tpu.memory_space<vmem>>, vector<8x8xf32>
    %cst_9 = arith.constant dense<0.000000e+00> : vector<8x16xf32>
    %18 = tpu.matmul %17, %16, %cst_9 {dimension_numbers = #tpu.dot_dimension_numbers<[1], [0], [0], [1], [0, 0, 1, 1], [], []>} : vector<8x8xf32>, vector<8x16xf32>, vector<8x16xf32> -> vector<8x16xf32>
    %c0_10 = arith.constant 0 : index
    %c0_11 = arith.constant 0 : index
    %19 = vector.load %arg6[%c0_10, %c0_11] : memref<8x1xf32, #tpu.memory_space<vmem>>, vector<8x1xf32>
    %20 = vector.broadcast %19 : vector<8x1xf32> to vector<8x16xf32>
    %21 = arith.addf %18, %20 : vector<8x16xf32>
    %22 = vector.extract_strided_slice %5 {offsets = [0, 2], sizes = [8, 16], strides = [1, 1]} : vector<8x20xf32> to vector<8x16xf32>
    %23 = arith.addf %22, %21 : vector<8x16xf32>
    %c0_12 = arith.constant 0 : index
    %c0_13 = arith.constant 0 : index
    %c0_14 = arith.constant 0 : index
    %24 = vector.load %arg7[%c0_12, %c0_13, %c0_14] : memref<1x8x16xf32, #tpu.memory_space<vmem>>, vector<1x8x16xf32>
    %25 = vector.shape_cast %24 : vector<1x8x16xf32> to vector<8x16xf32>
    %26 = vector.shape_cast %23 : vector<8x16xf32> to vector<1x8x16xf32>
    tpu.vector_store %arg7[%c0_12, %c0_13, %c0_14], %26 {strides = array<i32>} : memref<1x8x16xf32, #tpu.memory_space<vmem>>, vector<1x8x16xf32>,
    return
  }
  func.func @transform_0(%arg0: i32, %arg1: i32) -> (i32, i32, i32) {
    %c0_i32 = arith.constant 0 : i32
    %c0_i32_0 = arith.constant 0 : i32
    %c0_i32_1 = arith.constant 0 : i32
    return %arg0, %c0_i32, %c0_i32_0 : i32, i32, i32
  }
  func.func @transform_1(%arg0: i32, %arg1: i32) -> (i32, i32) {
    %c0_i32 = arith.constant 0 : i32
    %c0_i32_0 = arith.constant 0 : i32
    %c0_i32_1 = arith.constant 0 : i32
    return %c0_i32, %c0_i32_0 : i32, i32
  }
  func.func @transform_2(%arg0: i32, %arg1: i32) -> (i32, i32) {
    %c0_i32 = arith.constant 0 : i32
    %c0_i32_0 = arith.constant 0 : i32
    %c0_i32_1 = arith.constant 0 : i32
    return %c0_i32, %c0_i32_0 : i32, i32
  }
  func.func @transform_3(%arg0: i32, %arg1: i32) -> (i32, i32) {
    %c0_i32 = arith.constant 0 : i32
    %c0_i32_0 = arith.constant 0 : i32
    %c0_i32_1 = arith.constant 0 : i32
    return %c0_i32, %c0_i32_0 : i32, i32
  }
  func.func @transform_4(%arg0: i32, %arg1: i32) -> (i32, i32) {
    %c0_i32 = arith.constant 0 : i32
    %c0_i32_0 = arith.constant 0 : i32
    %c0_i32_1 = arith.constant 0 : i32
    return %c0_i32, %c0_i32_0 : i32, i32
  }
  func.func @transform_5(%arg0: i32, %arg1: i32) -> (i32, i32, i32) {
    %c0_i32 = arith.constant 0 : i32
    %c0_i32_0 = arith.constant 0 : i32
    return %arg0, %c0_i32, %arg1 : i32, i32, i32
  }
}

</mosaic_0001>

<bundles_post_ra>
// kernel: tpu_custom_call.1
= control target key start
LH: loop header
LB: loop body
LE: loop exit
PB: predicated region body
PF: predicated region fallthrough
CT: control target
= control target key end

     0   :  { %10 = vsyncpa [#allocation4], 0  ;;  %s891_s0 = inlined_call_operand.vmem [shape: f32[2,8,16], index: 0, kind: input, shape index: {}]   ;;  %s892_s1 = inlined_call_operand.hbm [shape: f32[8,24], index: 1, kind: input, shape index: {}]   ;;  %s893_s2 = inlined_call_operand.vmem [shape: f32[8,1], index: 2, kind: input, shape index: {}]   ;;  %s894_s3 = inlined_call_operand.hbm [shape: f32[8,8], index: 3, kind: input, shape index: {}]   ;;  %s895_s4 = inlined_call_operand.vmem [shape: f32[8,1], index: 4, kind: input, shape index: {}]   ;;  %s896_s5 = inlined_call_operand.hbm [shape: f32[2,8,16], index: 5, kind: output, shape index: {}]  }
   0x1   :  { %11 = vsyncpa [#allocation7], 0 }
   0x2   :  { %12 = vsyncpa [#allocation5], 0 }
   0x3   :  { %14 = vsyncpa [#allocation5 + $0x1], 0  ;;  %s756_s18 = smov 0   ;;  %s758_s19 = smov 0  }
   0x4   :  { %s760_s20 = smov 0   ;;  %s762_s21 = smov 0  }
   0x5   :  { %s764_s22 = smov 0   ;;  %s766_s23 = smov 0  }
   0x6 LB: > { %s470_s24 = sadd.s32 4294967295, %s717_s23   ;;  %s471_s25 = sadd.s32 4294967294, %s717_s23   ;;  %s717_s23 = sphi %s766_s23, %s20_s23   ;;  %s713_s22 = sphi %s764_s22, %s905_s22   ;;  %s709_s21 = sphi %s762_s21, %s904_s21   ;;  %s705_s20 = sphi %s760_s20, %s903_s20   ;;  %s701_s19 = sphi %s758_s19, %s902_s19   ;;  %s697_s18 = sphi %s756_s18, %s901_s18  }
   0x7   : > { %s32_s26 = sadd.s32 1, %s713_s22  ;;  %s151_s27 = sadd.s32 1, %s705_s20 }
   0x8   : > { %p34_p0 = scmp.ge.s32.totalorder %s32_s26, 2  ;;  %p161_p1 = scmp.ne.s32.totalorder %s705_s20, %s701_s19 }
   0x9   : > { %p162_p2 = scmp.eq.s32.totalorder %s470_s24, 1  ;;  %p167_p3 = scmp.ne.s32.totalorder %s701_s19, %s697_s18 }
   0xa   : > { %s907_s26 = smov (%p34_p0, %s32_s26), 0  ;;  %p168_p5 = scmp.eq.s32.totalorder %s471_s25, 1 }
   0xb   : > { %p796_p4 = por %p162_p2, %p161_p1  ;;  %s146_s29 = ssub.s32 %s713_s22, %s907_s26 }
   0xc   : > { %p472_p6 = scmp.ge.s32.totalorder %s717_s23, 1  ;;  %p149_p7 = scmp.eq.s32.totalorder %s146_s29, 0 }
   0xd   : > { %p803_p8 = por %p168_p5, %p167_p3  ;;  %p175_p9 = scmp.lt.s32.totalorder %s717_s23, 3 }
   0xe   : > { %s809_s6 = scalar_select %p149_p7, %s705_s20, %s151_s27  }
   0xf   : > { %p811_p10 = pnand %p472_p6, %p175_p9  ;;  %p815_p11 = scmp.eq.s32.totalorder %s470_s24, 0 }
  0x10   : > { %s187_s11 = sshll.u32 %s892_s1, 4  ;;  %s719_s12 = smov [#allocation3]   ;;  %s188_s11 = int_to_ptr.hbm [resolvable:$true] %s187_s11 }
  0x11   : > { %p497_p12 = pneg %p811_p10  ;;  %s189_s13 = sshll.u32 %s719_s12, 4  ;;  %s190_s13 = int_to_ptr.vmem [resolvable:$true] %s189_s13 }
  0x12   : > { %s202_s16 = sshll.u32 %s894_s3, 4  ;;  %s720_s17 = smov [#allocation6]   ;;  %s203_s16 = int_to_ptr.hbm [resolvable:$true] %s202_s16 }
  0x13   : > { %p498_p13 = pnand %p815_p11, %p497_p12  ;;  %s204_s24 = sshll.u32 %s720_s17, 4  ;;  %s205_s24 = int_to_ptr.vmem [resolvable:$true] %s204_s24 }
  0x14   : > { %227 = sbr.rel (%p811_p10) target bundleno = 748 (0x2ec), region = 40 }
  0x15   : > { %500 = dma.hbm_to_vmem [thread:$0]  (!%p498_p13), %s188_s11, 128, %s190_s13, [#allocation4]  }
  0x16   : > { %503 = dma.hbm_to_vmem [thread:$0]  (!%p498_p13), %s203_s16, 128, %s205_s24, [#allocation7]  }
  0x19   : > { %684 = dma.done.wait (%p815_p11), [#allocation4], 128  }
  0x1a   : > { %686 = vsyncadd (%p815_p11), [#allocation4], 4294967168 }
  0x1b   : > { %688 = dma.done.wait (%p815_p11), [#allocation7], 128  }
  0x1c   : > { %690 = vsyncadd (%p815_p11), [#allocation7], 4294967168  ;;  %p260_p0 = scmp.lt.s32.totalorder %s709_s21, 1  ;;  %vm268_vm0 = vcmask 162816   ;;  %v721_v0 = vmov 0.0   ;;  %s722_s10 = smov 2  }
  0x1d   : > { %269 = vst.msk [vmem:[#allocation2] sm:$0xff] %vm268_vm0, %v721_v0  ;;  %vm275_vm1 = vcmask 146448   ;;  %s723_s8 = smov 126   ;;  %s724_s11 = smov 124   ;;  %v288_v4 = vld [vmem:[%s893_s2] sm:$0xff]  ;;  %v725_v5 = vmov 0  }
  0x1e   : > { %s261_s25 = scalar_select %p260_p0, %s709_s21, 1  ;;  %568 = vset.pattern.permute.xlu1 %v725_v5  ;;  %569 = vset.pattern.permute.xlu2 %v725_v5  ;;  %v287_v8 = vld [vmem:[#allocation3] sm:$0xff]  ;;  %vm294_vm2 = vcmask 195584   ;;  %v320_v9 = vld [vmem:[%s895_s4] sm:$0xff]  ;;  %v319_v14 = vld [vmem:[#allocation6] sm:$0xff]  ;;  %vm326_vm3 = vcmask 64512  }
  0x1f   : > { %570 = vset.pattern.permute.xlu0 %v725_v5  ;;  %323 = vperm.xlu2 %569, %v320_v9   ;;  %s257_s16 = sand.u32 1, %s701_s19   ;;  %s484_s24 = sshll.u32 %s709_s21, 3  ;;  %vm359_vm4 = vcmask 130048  }
  0x20   : > { %s480_s27 = sshll.u32 %s261_s25, 3  ;;  %s479_s17 = sshll.u32 %s257_s16, 3 }
  0x21   : > { %s263_s9 = scalar_lea.vmem %s891_s0, %s480_s27  ;;  %s373_s29 = scalar_lea.hbm %s896_s5, %s484_s24 }
  0x22   : > { %v270_v1 = vld [vmem:[%s263_s9] sm:$0xff]  ;;  %s259_s7 = scalar_lea.vmem [#allocation8], %s479_s17  ;;  %s651_s14 = scalar_lea.hbm %s896_s5, 16 }
  0x23   : > { %272 = vrot.lane.b32.xlu0 %v270_v1, %s722_s10  ;;  %s375_s9 = sshll.u32 %s259_s7, 4  ;;  %s376_s9 = int_to_ptr.vmem [resolvable:$true] %s375_s9 }
  0x79   : > { %v324_v15 = vpop.permute.xlu2 %323 }
  0x95   : > { %v273_v2 = vpop.permute.xlu0 %272 }
  0x96   : > { %276 = vst.msk [vmem:[#allocation2] sm:$0xff] %vm275_vm1, %v273_v2 }
  0x9d   : > { %v279_v3 = vld [vmem:[#allocation2] sm:$0xff] }
  0x9e   : > { %281 = vrot.lane.b32.xlu1 %v279_v3, %s723_s8  ;;  %284 = vrot.lane.b32.xlu0 %v279_v3, %s724_s11  ;;  %s377_s11 = sshll.u32 %s373_s29, 4  ;;  %s378_s11 = int_to_ptr.hbm [resolvable:$true] %s377_s11 }
  0x9f   : > { %s645_s12 = sshra.s32 %s378_s11, 4  ;;  %s646_s12 = int_to_ptr.hbm [resolvable:$true] %s645_s12 }
  0xa0   : > { %p652_p5 = scmp.lt.s32.totalorder %s646_s12, %s896_s5 }
  0xa6   : > { %291 = vperm.xlu1 %568, %v288_v4  }
 0x110   : > { %v285_v6 = vpop.permute.xlu0 %284  ;;  %v282_v7 = vpop.permute.xlu1 %281 }
 0x111   : > { %311 = vmatpush.msra.mxu0 %v285_v6 }
 0x113   : > { %312 = vmatpush.msra.mxu0 %v282_v7 }
 0x115   : > { %313 = vmatpush.msra.mxu0 %v279_v3 }
 0x116   : > { %481 = vmatmul.msk.f32.vlgmr.msra.gmra.mxu0 %vm294_vm2, %v287_v8 }
 0x118   : > { %v292_v10 = vpop.permute.xlu1 %291 }
 0x193   : > { %v315_v11 = vpop.f32.mrf.mxu0 }
 0x194   : > { %v316_v12 = vadd.f32 %v315_v11, %v292_v10 }
 0x196   : > { %v318_v13 = vmax.f32 %v316_v12, 0.0 }
 0x198   : > { %345 = vmatpush.msra.mxu1 %v318_v13 }
 0x199   : > { %482 = vmatmul.msk.f32.vlgmr.msra.gmra.mxu1 %vm326_vm3, %v319_v14 }
 0x216   : > { %v347_v16 = vpop.f32.mrf.mxu1 }
 0x217   : > { %v348_v17 = vadd.f32 %v347_v16, %v324_v15 }
 0x219   : > { %351 = vrot.lane.b32.xlu2 %v348_v17, %s722_s10  ;;  %s362_s10 = scalar_lea.sflag [#allocation5], %s257_s16 }
 0x273   : > { %v352_v18 = vpop.permute.xlu2 %351 }
 0x274   : > { %v354_v19 = vadd.f32 %v352_v18, %v279_v3 }
 0x276   : > { %356 = vrot.lane.b32.xlu0 %v354_v19, %s723_s8  ;;  %s647_s8 = scalar_lea.hbm %s646_s12, 8 }
 0x277   : > { %p648_p1 = scmp.ne.s32.totalorder %s646_s12, %s647_s8  ;;  %p653_p6 = scmp.lt.s32.totalorder %s651_s14, %s647_s8 }
 0x279   : > { %p649_p2 = pnand %p648_p1, %p796_p4  ;;  %p654_p7 = por %p653_p6, %p652_p5 }
 0x27b   : > { %p650_p3 = pneg %p649_p2 }
 0x27d   : > { %p655_p9 = pnand %p654_p7, %p650_p3 }
 0x2e8   : > { %v357_v20 = vpop.permute.xlu0 %356 }
 0x2e9   : > { %360 = vst.msk [vmem:[%s259_s7] sm:$0xff] %vm359_vm4, %v357_v20 }
 0x2ea   : > { %658 = shalt.err (!%p655_p9)
}
 0x2eb   : > { %495 = dma.vmem_to_hbm [thread:$0]  (%p796_p4), %s376_s9, 128, %s378_s11, %s362_s10  }
 0x2ec PF: > { %p512_p10 = scmp.ge.s32.totalorder %s717_s23, 2  ;;  %s389_s16 = sand.u32 1, %s697_s18  }
 0x2ed   : > { %s390_s24 = scalar_lea.sflag [#allocation5], %s389_s16 }
 0x2ee   : > { %p505_p11 = pnand %p512_p10, %p803_p8 }
 0x2f0   : > { %p506_p12 = pneg %p505_p11 }
 0x2f2   : > { %692 = dma.done.wait (%p506_p12), %s390_s24, 128  }
 0x2f3   : > { %694 = vsyncadd (%p506_p12), %s390_s24, 4294967168  ;;  %s20_s23 = sadd.s32 1, %s717_s23   ;;  %s901_s18 = smov %s701_s19 }
 0x2f4   : > { %p17_p13 = scmp.ge.s32.totalorder %s20_s23, 4   ;;  %s902_s19 = smov %s705_s20 }
 0x2f5   : > { %s903_s20 = smov %s809_s6  ;;  %s904_s21 = smov %s713_s22 }
 0x2f6   : > { %s905_s22 = smov %s907_s26  ;;  %19 = sbr.rel (!%p17_p13) target bundleno = 6 (0x6), region = 89 }
 0x2fb   :  { %396 = vsyncpa [#allocation4], 1 }
 0x2fc   :  { %398 = vsyncpa [#allocation4 + $0x1], 1 }
 0x2fd   :  { %399 = vsyncpa [#allocation7], 1 }
 0x2fe   :  { %400 = vsyncpa [#allocation5], 1 }
 0x2ff   :  { %402 = vsyncpa [#allocation5 + $0x1], 1 }

</bundles_post_ra>
